<compile_context>
chip_gen: v6e
topology: v6e:2x2x1
jax: 0.10.0
libtpu: 0.0.40
codegen_flags: <defaults>
</compile_context>

<pallas_src>
import jax
import jax.numpy as jnp
from jax.experimental import pallas as pl
from jax.experimental.pallas import tpu as pltpu


def _round_up(n, m):
    return ((n + m - 1) // m) * m


def _pick_blocking(B, C, HW, block_budget_bytes):
    """Samples per grid step (multiple of 8) sized from a VMEM byte budget."""
    padded_c = _round_up(C, 8)                 # sublane padding of (C, HW) tiles
    per_bb = 2 * 2 * padded_c * HW * 4         # 2 input streams x 2 pipeline bufs
    bb_cap = max(8, (block_budget_bytes // per_bb) // 8 * 8)
    nblk = max(1, -(-B // bb_cap))
    if nblk == 1 and B > 8:
        nblk = 2                               # keep both v7x TensorCores busy
    bb = min(bb_cap, _round_up(-(-B // nblk), 8))
    b_pad = _round_up(B, bb)
    return bb, b_pad // bb, b_pad


def _fm_loss_kernel(t_ref, bias_ref, x0_ref, nz_ref, wm_ref, psum_ref):
    """One grid step: a block of bb samples -> (1, HW) partial sum of sq errors."""
    C = x0_ref.shape[1]

    t = t_ref[...]                  # (bb, 1) f32, broadcasts along the lane axis
    om_t = 1.0 - t
    bias = bias_ref[...]            # (bb, C) f32 (precomputed model bias)

    x0 = x0_ref[...]                # (bb, C, HW)
    nz = nz_ref[...]

    # Dense (bb, HW) per-channel slabs: all heavy VPU work runs on full
    # 8-sublane vregs (the (C=4, HW) trailing tile alone would only half-fill).
    xs = [x0[:, i, :] for i in range(C)]
    ns = [nz[:, i, :] for i in range(C)]
    pert = [t * xs[i] + om_t * ns[i] for i in range(C)]   # t*x0 + (1-t)*noise
    tgt = [xs[i] - ns[i] for i in range(C)]               # x0 - noise

    acc = None
    for o in range(C):
        # 1x1-conv channel mix as C broadcast FMAs on the VPU (wm scalars in
        # SMEM); per-sample bias folded into the accumulator start.
        h = bias[:, o:o + 1] + wm_ref[0, o] * pert[0]
        for i in range(1, C):
            h = h + wm_ref[i, o] * pert[i]
        diff = h - tgt[o]
        sq = diff * diff
        acc = sq if acc is None else acc + sq              # (bb, HW)

    # In-kernel sublane reduce: each block writes only a lane-dense (1, HW)
    # partial sum (writeback ~bb*C smaller than the inputs).
    psum_ref[0] = jnp.sum(acc, axis=0, keepdims=True)


def flow_matching_loss(x0_nchw, c, params, key, *, T=1.0, eps=1e-3,
                       block_budget_bytes=12 << 20,
                       vmem_limit_bytes=48 << 20):
    """Pallas implementation of FlowMatchingTrainer.forward (scalar loss)."""
    B, C, H, W = x0_nchw.shape
    HW = H * W
    wm, bm, wt, bt, wc = params

    k_t, k_n = jax.random.split(key)
    # t = rand(B) * (T - eps) + eps ; noise = randn_like(x_0)
    t = jax.random.uniform(k_t, (B,), dtype=jnp.float32) * (T - eps) + eps
    noise = jax.random.normal(k_n, x0_nchw.shape, dtype=jnp.float32)

    # Tiny (B, C) per-sample/per-channel model bias, hoisted out of the kernel:
    #   bm + tanh(999*t*wt + bt) + c @ wc        (O(B*C*Dc) -- negligible)
    bias = (bm[None, :]
            + jnp.tanh((t * 999.0)[:, None] * wt[None, :] + bt[None, :])
            + c.astype(jnp.float32) @ wc)

    # NCHW -> (B, C, HW): pure reshape, no transpose, no extra HBM pass.
    x0 = x0_nchw.reshape(B, C, HW)
    nz = noise.reshape(B, C, HW)

    bb, nblk, b_pad = _pick_blocking(B, C, HW, block_budget_bytes)

    pad = b_pad - B
    if pad:
        # Zero-padded samples contribute exactly 0 to the partial sums.
        x0 = jnp.pad(x0, ((0, pad), (0, 0), (0, 0)))
        nz = jnp.pad(nz, ((0, pad), (0, 0), (0, 0)))
        bias = jnp.pad(bias, ((0, pad), (0, 0)))
        t_pad = jnp.pad(t, (0, pad), constant_values=1.0)
    else:
        t_pad = t
    t_col = t_pad.reshape(b_pad, 1)

    psums = pl.pallas_call(
        _fm_loss_kernel,
        out_shape=jax.ShapeDtypeStruct((nblk, 1, HW), jnp.float32),
        grid_spec=pltpu.PrefetchScalarGridSpec(
            num_scalar_prefetch=0,
            grid=(nblk,),
            in_specs=[
                pl.BlockSpec((bb, 1), lambda g: (g, 0)),            # t column
                pl.BlockSpec((bb, C), lambda g: (g, 0)),            # model bias
                pl.BlockSpec((bb, C, HW), lambda g: (g, 0, 0)),     # x0
                pl.BlockSpec((bb, C, HW), lambda g: (g, 0, 0)),     # noise
                pl.BlockSpec(memory_space=pltpu.MemorySpace.SMEM),  # wm scalars
            ],
            out_specs=pl.BlockSpec((1, 1, HW), lambda g: (g, 0, 0)),
        ),
        compiler_params=pltpu.CompilerParams(
            dimension_semantics=("parallel",),      # disjoint per-block outputs
            vmem_limit_bytes=vmem_limit_bytes,
        ),
    )(t_col, bias, x0, nz, wm)

    # Tiny epilogue reduce (nblk*HW floats) + the mean([1,2,3]).mean() scale.
    loss = jnp.sum(psums) * (1.0 / (B * C * HW))
    return loss, (t, noise)


def _reference_loss(x0_nchw, c, params, t, noise):
    """Pure-JAX reference mirroring the PyTorch forward semantics."""
    B, C, H, W = x0_nchw.shape
    wm, bm, wt, bt, wc = params
    x0 = x0_nchw.reshape(B, C, H * W)
    nz = noise.reshape(B, C, H * W)
    t_e = t[:, None, None]
    perturbed = t_e * x0 + (1.0 - t_e) * nz
    target = x0 - nz
    h = jnp.einsum('ij,bik->bjk', wm, perturbed)                      # 1x1 conv
    bias = (bm[None, :]
            + jnp.tanh((t * 999.0)[:, None] * wt[None, :] + bt[None, :])
            + c.astype(jnp.float32) @ wc)                             # (B, C)
    h = h + bias[:, :, None]
    per_sample = jnp.mean((h - target) ** 2, axis=(1, 2))             # mean([1,2,3])
    return jnp.mean(per_sample)


def init_params(C, Dc, key):
    k1, k2, k3 = jax.random.split(key, 3)
    wm = jax.random.normal(k1, (C, C), dtype=jnp.float32) * 0.2
    bm = jnp.zeros((C,), dtype=jnp.float32)
    wt = jax.random.normal(k2, (C,), dtype=jnp.float32) * 0.02
    bt = jnp.zeros((C,), dtype=jnp.float32)
    wc = jax.random.normal(k3, (Dc, C), dtype=jnp.float32) * 0.2
    return wm, bm, wt, bt, wc


if __name__ == "__main__":
    B, C, H, W = 2, 4, 16, 16
    Dc = 8

    key = jax.random.PRNGKey(0)
    k_x, k_c, k_p, k_fwd = jax.random.split(key, 4)

    x0 = jax.random.normal(k_x, (B, C, H, W), dtype=jnp.float32)   # NCHW, as in torch
    cond = jax.random.normal(k_c, (B, Dc), dtype=jnp.float32)
    params = init_params(C, Dc, k_p)

    loss, (t, noise) = flow_matching_loss(x0, cond, params, k_fwd)
    loss = jax.block_until_ready(loss)

    ref = _reference_loss(x0, cond, params, t, noise)
    assert jnp.allclose(loss, ref, rtol=1e-3, atol=1e-3), (loss, ref)

    print("KERNEL_OK")
</pallas_src>

<mosaic_0001>
module attributes {stable_mosaic.version = 11 : i64} {
  func.func @_fm_loss_kernel(%arg0: i32, %arg1: memref<8x1xf32, #tpu.memory_space<vmem>>, %arg2: memref<8x4xf32, #tpu.memory_space<vmem>>, %arg3: memref<8x4x256xf32, #tpu.memory_space<vmem>>, %arg4: memref<8x4x256xf32, #tpu.memory_space<vmem>>, %arg5: memref<4x4xf32, #tpu.memory_space<smem>>, %arg6: memref<1x1x256xf32, #tpu.memory_space<vmem>>) attributes {dimension_semantics = [#tpu.dimension_semantics<parallel>], iteration_bounds = array<i64: 1>, scalar_prefetch = 0 : i64, scratch_operands = 0 : i64, tpu.core_type = #tpu.core_type<tc>, window_params = [{transform_indices = @transform_0, window_bounds = array<i64: 8, 1>}, {transform_indices = @transform_1, window_bounds = array<i64: 8, 4>}, {transform_indices = @transform_2, window_bounds = array<i64: 8, 4, 256>}, {transform_indices = @transform_3, window_bounds = array<i64: 8, 4, 256>}, {transform_indices = @transform_4, window_bounds = array<i64: 4, 4>}, {transform_indices = @transform_5, window_bounds = array<i64: 1, 1, 256>}]} {
    %c0 = arith.constant 0 : index
    %c0_0 = arith.constant 0 : index
    %0 = vector.load %arg1[%c0, %c0_0] : memref<8x1xf32, #tpu.memory_space<vmem>>, vector<8x1xf32>
    %cst = arith.constant 1.000000e+00 : f32
    %1 = vector.broadcast %cst : f32 to vector<8x1xf32>
    %2 = arith.subf %1, %0 : vector<8x1xf32>
    %c0_1 = arith.constant 0 : index
    %c0_2 = arith.constant 0 : index
    %3 = vector.load %arg2[%c0_1, %c0_2] : memref<8x4xf32, #tpu.memory_space<vmem>>, vector<8x4xf32>
    %c0_3 = arith.constant 0 : index
    %c0_4 = arith.constant 0 : index
    %c0_5 = arith.constant 0 : index
    %4 = vector.load %arg3[%c0_3, %c0_4, %c0_5] : memref<8x4x256xf32, #tpu.memory_space<vmem>>, vector<8x4x256xf32>
    %c0_6 = arith.constant 0 : index
    %c0_7 = arith.constant 0 : index
    %c0_8 = arith.constant 0 : index
    %5 = vector.load %arg4[%c0_6, %c0_7, %c0_8] : memref<8x4x256xf32, #tpu.memory_space<vmem>>, vector<8x4x256xf32>
    %6 = vector.extract_strided_slice %4 {offsets = [0, 0, 0], sizes = [8, 1, 256], strides = [1, 1, 1]} : vector<8x4x256xf32> to vector<8x1x256xf32>
    %7 = vector.shape_cast %6 : vector<8x1x256xf32> to vector<8x256xf32>
    %8 = vector.extract_strided_slice %4 {offsets = [0, 1, 0], sizes = [8, 1, 256], strides = [1, 1, 1]} : vector<8x4x256xf32> to vector<8x1x256xf32>
    %9 = vector.shape_cast %8 : vector<8x1x256xf32> to vector<8x256xf32>
    %10 = vector.extract_strided_slice %4 {offsets = [0, 2, 0], sizes = [8, 1, 256], strides = [1, 1, 1]} : vector<8x4x256xf32> to vector<8x1x256xf32>
    %11 = vector.shape_cast %10 : vector<8x1x256xf32> to vector<8x256xf32>
    %12 = vector.extract_strided_slice %4 {offsets = [0, 3, 0], sizes = [8, 1, 256], strides = [1, 1, 1]} : vector<8x4x256xf32> to vector<8x1x256xf32>
    %13 = vector.shape_cast %12 : vector<8x1x256xf32> to vector<8x256xf32>
    %14 = vector.extract_strided_slice %5 {offsets = [0, 0, 0], sizes = [8, 1, 256], strides = [1, 1, 1]} : vector<8x4x256xf32> to vector<8x1x256xf32>
    %15 = vector.shape_cast %14 : vector<8x1x256xf32> to vector<8x256xf32>
    %16 = vector.extract_strided_slice %5 {offsets = [0, 1, 0], sizes = [8, 1, 256], strides = [1, 1, 1]} : vector<8x4x256xf32> to vector<8x1x256xf32>
    %17 = vector.shape_cast %16 : vector<8x1x256xf32> to vector<8x256xf32>
    %18 = vector.extract_strided_slice %5 {offsets = [0, 2, 0], sizes = [8, 1, 256], strides = [1, 1, 1]} : vector<8x4x256xf32> to vector<8x1x256xf32>
    %19 = vector.shape_cast %18 : vector<8x1x256xf32> to vector<8x256xf32>
    %20 = vector.extract_strided_slice %5 {offsets = [0, 3, 0], sizes = [8, 1, 256], strides = [1, 1, 1]} : vector<8x4x256xf32> to vector<8x1x256xf32>
    %21 = vector.shape_cast %20 : vector<8x1x256xf32> to vector<8x256xf32>
    %22 = vector.broadcast %0 : vector<8x1xf32> to vector<8x256xf32>
    %23 = arith.mulf %22, %7 : vector<8x256xf32>
    %24 = vector.broadcast %2 : vector<8x1xf32> to vector<8x256xf32>
    %25 = arith.mulf %24, %15 : vector<8x256xf32>
    %26 = arith.addf %23, %25 : vector<8x256xf32>
    %27 = vector.broadcast %0 : vector<8x1xf32> to vector<8x256xf32>
    %28 = arith.mulf %27, %9 : vector<8x256xf32>
    %29 = vector.broadcast %2 : vector<8x1xf32> to vector<8x256xf32>
    %30 = arith.mulf %29, %17 : vector<8x256xf32>
    %31 = arith.addf %28, %30 : vector<8x256xf32>
    %32 = vector.broadcast %0 : vector<8x1xf32> to vector<8x256xf32>
    %33 = arith.mulf %32, %11 : vector<8x256xf32>
    %34 = vector.broadcast %2 : vector<8x1xf32> to vector<8x256xf32>
    %35 = arith.mulf %34, %19 : vector<8x256xf32>
    %36 = arith.addf %33, %35 : vector<8x256xf32>
    %37 = vector.broadcast %0 : vector<8x1xf32> to vector<8x256xf32>
    %38 = arith.mulf %37, %13 : vector<8x256xf32>
    %39 = vector.broadcast %2 : vector<8x1xf32> to vector<8x256xf32>
    %40 = arith.mulf %39, %21 : vector<8x256xf32>
    %41 = arith.addf %38, %40 : vector<8x256xf32>
    %42 = arith.subf %7, %15 : vector<8x256xf32>
    %43 = arith.subf %9, %17 : vector<8x256xf32>
    %44 = arith.subf %11, %19 : vector<8x256xf32>
    %45 = arith.subf %13, %21 : vector<8x256xf32>
    %46 = vector.extract_strided_slice %3 {offsets = [0, 0], sizes = [8, 1], strides = [1, 1]} : vector<8x4xf32> to vector<8x1xf32>
    %c0_9 = arith.constant 0 : index
    %c0_10 = arith.constant 0 : index
    %47 = memref.load %arg5[%c0_9, %c0_10] : memref<4x4xf32, #tpu.memory_space<smem>>
    %48 = vector.broadcast %47 : f32 to vector<8x256xf32>
    %49 = arith.mulf %48, %26 : vector<8x256xf32>
    %50 = vector.broadcast %46 : vector<8x1xf32> to vector<8x256xf32>
    %51 = arith.addf %50, %49 : vector<8x256xf32>
    %c1 = arith.constant 1 : index
    %c0_11 = arith.constant 0 : index
    %52 = memref.load %arg5[%c1, %c0_11] : memref<4x4xf32, #tpu.memory_space<smem>>
    %53 = vector.broadcast %52 : f32 to vector<8x256xf32>
    %54 = arith.mulf %53, %31 : vector<8x256xf32>
    %55 = arith.addf %51, %54 : vector<8x256xf32>
    %c2 = arith.constant 2 : index
    %c0_12 = arith.constant 0 : index
    %56 = memref.load %arg5[%c2, %c0_12] : memref<4x4xf32, #tpu.memory_space<smem>>
    %57 = vector.broadcast %56 : f32 to vector<8x256xf32>
    %58 = arith.mulf %57, %36 : vector<8x256xf32>
    %59 = arith.addf %55, %58 : vector<8x256xf32>
    %c3 = arith.constant 3 : index
    %c0_13 = arith.constant 0 : index
    %60 = memref.load %arg5[%c3, %c0_13] : memref<4x4xf32, #tpu.memory_space<smem>>
    %61 = vector.broadcast %60 : f32 to vector<8x256xf32>
    %62 = arith.mulf %61, %41 : vector<8x256xf32>
    %63 = arith.addf %59, %62 : vector<8x256xf32>
    %64 = arith.subf %63, %42 : vector<8x256xf32>
    %65 = arith.mulf %64, %64 : vector<8x256xf32>
    %66 = vector.extract_strided_slice %3 {offsets = [0, 1], sizes = [8, 1], strides = [1, 1]} : vector<8x4xf32> to vector<8x1xf32>
    %c0_14 = arith.constant 0 : index
    %c1_15 = arith.constant 1 : index
    %67 = memref.load %arg5[%c0_14, %c1_15] : memref<4x4xf32, #tpu.memory_space<smem>>
    %68 = vector.broadcast %67 : f32 to vector<8x256xf32>
    %69 = arith.mulf %68, %26 : vector<8x256xf32>
    %70 = vector.broadcast %66 : vector<8x1xf32> to vector<8x256xf32>
    %71 = arith.addf %70, %69 : vector<8x256xf32>
    %c1_16 = arith.constant 1 : index
    %c1_17 = arith.constant 1 : index
    %72 = memref.load %arg5[%c1_16, %c1_17] : memref<4x4xf32, #tpu.memory_space<smem>>
    %73 = vector.broadcast %72 : f32 to vector<8x256xf32>
    %74 = arith.mulf %73, %31 : vector<8x256xf32>
    %75 = arith.addf %71, %74 : vector<8x256xf32>
    %c2_18 = arith.constant 2 : index
    %c1_19 = arith.constant 1 : index
    %76 = memref.load %arg5[%c2_18, %c1_19] : memref<4x4xf32, #tpu.memory_space<smem>>
    %77 = vector.broadcast %76 : f32 to vector<8x256xf32>
    %78 = arith.mulf %77, %36 : vector<8x256xf32>
    %79 = arith.addf %75, %78 : vector<8x256xf32>
    %c3_20 = arith.constant 3 : index
    %c1_21 = arith.constant 1 : index
    %80 = memref.load %arg5[%c3_20, %c1_21] : memref<4x4xf32, #tpu.memory_space<smem>>
    %81 = vector.broadcast %80 : f32 to vector<8x256xf32>
    %82 = arith.mulf %81, %41 : vector<8x256xf32>
    %83 = arith.addf %79, %82 : vector<8x256xf32>
    %84 = arith.subf %83, %43 : vector<8x256xf32>
    %85 = arith.mulf %84, %84 : vector<8x256xf32>
    %86 = arith.addf %65, %85 : vector<8x256xf32>
    %87 = vector.extract_strided_slice %3 {offsets = [0, 2], sizes = [8, 1], strides = [1, 1]} : vector<8x4xf32> to vector<8x1xf32>
    %c0_22 = arith.constant 0 : index
    %c2_23 = arith.constant 2 : index
    %88 = memref.load %arg5[%c0_22, %c2_23] : memref<4x4xf32, #tpu.memory_space<smem>>
    %89 = vector.broadcast %88 : f32 to vector<8x256xf32>
    %90 = arith.mulf %89, %26 : vector<8x256xf32>
    %91 = vector.broadcast %87 : vector<8x1xf32> to vector<8x256xf32>
    %92 = arith.addf %91, %90 : vector<8x256xf32>
    %c1_24 = arith.constant 1 : index
    %c2_25 = arith.constant 2 : index
    %93 = memref.load %arg5[%c1_24, %c2_25] : memref<4x4xf32, #tpu.memory_space<smem>>
    %94 = vector.broadcast %93 : f32 to vector<8x256xf32>
    %95 = arith.mulf %94, %31 : vector<8x256xf32>
    %96 = arith.addf %92, %95 : vector<8x256xf32>
    %c2_26 = arith.constant 2 : index
    %c2_27 = arith.constant 2 : index
    %97 = memref.load %arg5[%c2_26, %c2_27] : memref<4x4xf32, #tpu.memory_space<smem>>
    %98 = vector.broadcast %97 : f32 to vector<8x256xf32>
    %99 = arith.mulf %98, %36 : vector<8x256xf32>
    %100 = arith.addf %96, %99 : vector<8x256xf32>
    %c3_28 = arith.constant 3 : index
    %c2_29 = arith.constant 2 : index
    %101 = memref.load %arg5[%c3_28, %c2_29] : memref<4x4xf32, #tpu.memory_space<smem>>
    %102 = vector.broadcast %101 : f32 to vector<8x256xf32>
    %103 = arith.mulf %102, %41 : vector<8x256xf32>
    %104 = arith.addf %100, %103 : vector<8x256xf32>
    %105 = arith.subf %104, %44 : vector<8x256xf32>
    %106 = arith.mulf %105, %105 : vector<8x256xf32>
    %107 = arith.addf %86, %106 : vector<8x256xf32>
    %108 = vector.extract_strided_slice %3 {offsets = [0, 3], sizes = [8, 1], strides = [1, 1]} : vector<8x4xf32> to vector<8x1xf32>
    %c0_30 = arith.constant 0 : index
    %c3_31 = arith.constant 3 : index
    %109 = memref.load %arg5[%c0_30, %c3_31] : memref<4x4xf32, #tpu.memory_space<smem>>
    %110 = vector.broadcast %109 : f32 to vector<8x256xf32>
    %111 = arith.mulf %110, %26 : vector<8x256xf32>
    %112 = vector.broadcast %108 : vector<8x1xf32> to vector<8x256xf32>
    %113 = arith.addf %112, %111 : vector<8x256xf32>
    %c1_32 = arith.constant 1 : index
    %c3_33 = arith.constant 3 : index
    %114 = memref.load %arg5[%c1_32, %c3_33] : memref<4x4xf32, #tpu.memory_space<smem>>
    %115 = vector.broadcast %114 : f32 to vector<8x256xf32>
    %116 = arith.mulf %115, %31 : vector<8x256xf32>
    %117 = arith.addf %113, %116 : vector<8x256xf32>
    %c2_34 = arith.constant 2 : index
    %c3_35 = arith.constant 3 : index
    %118 = memref.load %arg5[%c2_34, %c3_35] : memref<4x4xf32, #tpu.memory_space<smem>>
    %119 = vector.broadcast %118 : f32 to vector<8x256xf32>
    %120 = arith.mulf %119, %36 : vector<8x256xf32>
    %121 = arith.addf %117, %120 : vector<8x256xf32>
    %c3_36 = arith.constant 3 : index
    %c3_37 = arith.constant 3 : index
    %122 = memref.load %arg5[%c3_36, %c3_37] : memref<4x4xf32, #tpu.memory_space<smem>>
    %123 = vector.broadcast %122 : f32 to vector<8x256xf32>
    %124 = arith.mulf %123, %41 : vector<8x256xf32>
    %125 = arith.addf %121, %124 : vector<8x256xf32>
    %126 = arith.subf %125, %45 : vector<8x256xf32>
    %127 = arith.mulf %126, %126 : vector<8x256xf32>
    %128 = arith.addf %107, %127 : vector<8x256xf32>
    %cst_38 = arith.constant dense<0.000000e+00> : vector<256xf32>
    %129 = vector.multi_reduction <add>, %128, %cst_38 [0] : vector<8x256xf32> to vector<256xf32>
    %130 = vector.shape_cast %129 : vector<256xf32> to vector<1x256xf32>
    %c0_39 = arith.constant 0 : index
    %c0_40 = arith.constant 0 : index
    %c0_41 = arith.constant 0 : index
    %131 = vector.load %arg6[%c0_39, %c0_40, %c0_41] : memref<1x1x256xf32, #tpu.memory_space<vmem>>, vector<1x1x256xf32>
    %132 = vector.shape_cast %131 : vector<1x1x256xf32> to vector<1x256xf32>
    %133 = vector.shape_cast %130 : vector<1x256xf32> to vector<1x1x256xf32>
    tpu.vector_store %arg6[%c0_39, %c0_40, %c0_41], %133 {strides = array<i32>} : memref<1x1x256xf32, #tpu.memory_space<vmem>>, vector<1x1x256xf32>,
    return
  }
  func.func @transform_0(%arg0: i32) -> (i32, i32) {
    %c0_i32 = arith.constant 0 : i32
    %c0_i32_0 = arith.constant 0 : i32
    return %arg0, %c0_i32 : i32, i32
  }
  func.func @transform_1(%arg0: i32) -> (i32, i32) {
    %c0_i32 = arith.constant 0 : i32
    %c0_i32_0 = arith.constant 0 : i32
    return %arg0, %c0_i32 : i32, i32
  }
  func.func @transform_2(%arg0: i32) -> (i32, i32, i32) {
    %c0_i32 = arith.constant 0 : i32
    %c0_i32_0 = arith.constant 0 : i32
    %c0_i32_1 = arith.constant 0 : i32
    return %arg0, %c0_i32, %c0_i32_0 : i32, i32, i32
  }
  func.func @transform_3(%arg0: i32) -> (i32, i32, i32) {
    %c0_i32 = arith.constant 0 : i32
    %c0_i32_0 = arith.constant 0 : i32
    %c0_i32_1 = arith.constant 0 : i32
    return %arg0, %c0_i32, %c0_i32_0 : i32, i32, i32
  }
  func.func @transform_4(%arg0: i32) -> (i32, i32) {
    %c0_i32 = arith.constant 0 : i32
    %c0_i32_0 = arith.constant 0 : i32
    %c0_i32_1 = arith.constant 0 : i32
    return %c0_i32, %c0_i32_0 : i32, i32
  }
  func.func @transform_5(%arg0: i32) -> (i32, i32, i32) {
    %c0_i32 = arith.constant 0 : i32
    %c0_i32_0 = arith.constant 0 : i32
    %c0_i32_1 = arith.constant 0 : i32
    return %arg0, %c0_i32, %c0_i32_0 : i32, i32, i32
  }
}

</mosaic_0001>

<bundles_post_ra>
// kernel: tpu_custom_call.1
= control target key start
LH: loop header
LB: loop body
LE: loop exit
PB: predicated region body
PF: predicated region fallthrough
CT: control target
= control target key end

     0   :  { %10 = vsyncpa [#allocation3], 0  ;;  %s2325_s0 = inlined_call_operand.vmem [shape: f32[8,1], index: 0, kind: input, shape index: {}]   ;;  %s2326_s1 = inlined_call_operand.vmem [shape: f32[8,4], index: 1, kind: input, shape index: {}]   ;;  %s2327_s2 = inlined_call_operand.hbm [shape: f32[8,4,256], index: 2, kind: input, shape index: {}]   ;;  %s2328_s3 = inlined_call_operand.hbm [shape: f32[8,4,256], index: 3, kind: input, shape index: {}]   ;;  %s2329_s4 = inlined_call_operand.vmem [shape: f32[4,4], index: 4, kind: input, shape index: {}]   ;;  %s2330_s5 = inlined_call_operand.hbm [shape: f32[1,1,256], index: 5, kind: output, shape index: {}]  }
   0x1   :  { %11 = vsyncpa [#allocation7], 0 }
   0x2   :  { %12 = vsyncpa [#allocation5], 0 }
   0x3   :  { %13 = vsyncpa [#allocation4], 0  ;;  %s1413_s18 = smov [#allocation2]  }
   0x4   :  { %s23_s19 = sshll.u32 %s1413_s18, 4  ;;  %s24_s19 = int_to_ptr.vmem [resolvable:$true] %s23_s19 }
   0x5   :  { %s1341_s20 = scalar_lea.vmem %s24_s19, 1024  ;;  %p1346_p1 = scmp.lt.s32.totalorder %s24_s19, %s24_s19 }
   0x6   :  { %p1342_p0 = scmp.ne.s32.totalorder %s24_s19, %s1341_s20  ;;  %p1347_p2 = scmp.lt.s32.totalorder %s1341_s20, %s1341_s20 }
   0x8   :  { %p1348_p3 = por %p1347_p2, %p1346_p1 }
   0xa   :  { %p1349_p4 = pnand %p1348_p3, %p1342_p0 }
   0xc   :  { %1352 = shalt.err (!%p1349_p4)
}
   0xd   :  { %s1414_s21 = smov 128   ;;  %s1415_s22 = smov 8  }
   0xe   :  { %29 = dma.hbm_to_vmem [thread:$0]  %s2327_s2, 1024, %s24_s19, [#allocation3], %s1414_s21, %s1414_s21, %s1415_s22  }
   0xf   :  { %s1416_s25 = smov [#allocation6]   ;;  %s48_s29 = sshll.u32 %s2329_s4, 4  ;;  %s49_s29 = int_to_ptr.vmem [resolvable:$true] %s48_s29 }
  0x10   :  { %s35_s26 = sshll.u32 %s1416_s25, 4  ;;  %s36_s26 = int_to_ptr.vmem [resolvable:$true] %s35_s26 }
  0x11   :  { %s1361_s30 = scalar_lea.vmem %s36_s26, 1024  ;;  %p1366_p6 = scmp.lt.s32.totalorder %s36_s26, %s36_s26 }
  0x12   :  { %p1362_p5 = scmp.ne.s32.totalorder %s36_s26, %s1361_s30  ;;  %p1367_p7 = scmp.lt.s32.totalorder %s1361_s30, %s1361_s30 }
  0x14   :  { %p1368_p8 = por %p1367_p7, %p1366_p6 }
  0x16   :  { %p1369_p9 = pnand %p1368_p8, %p1362_p5 }
  0x18   :  { %1372 = shalt.err (!%p1369_p9)
}
  0x19   :  { %41 = dma.hbm_to_vmem [thread:$0]  %s2328_s3, 1024, %s36_s26, [#allocation7], %s1414_s21, %s1414_s21, %s1415_s22  }
  0x1a   :  { %s1373_s2 = scalar_lea.vmem %s49_s29, 64  ;;  %p1378_p11 = scmp.lt.s32.totalorder %s49_s29, %s49_s29 }
  0x1b   :  { %p1374_p10 = scmp.ne.s32.totalorder %s49_s29, %s1373_s2  ;;  %p1379_p12 = scmp.lt.s32.totalorder %s1373_s2, %s1373_s2 }
  0x1d   :  { %p1380_p13 = por %p1379_p12, %p1378_p11 }
  0x1f   :  { %p1381_p0 = pnand %p1380_p13, %p1374_p10 }
  0x21   :  { %1384 = shalt.err (!%p1381_p0)
}
  0x22   :  { %s1417_s4 = smov [#allocation8]  }
  0x23   :  { %51 = dma.vmem_to_smem %s49_s29, 64, %s1417_s4, [#allocation5]  }
  0x24   :  { %1405 = dma.done.wait [#allocation3], 1024  }
  0x25   :  { %1406 = vsyncadd [#allocation3], 4294966272 }
  0x26   :  { %1407 = dma.done.wait [#allocation7], 1024  }
  0x27   :  { %1408 = vsyncadd [#allocation7], 4294966272 }
  0x28   :  { %1409 = dma.done.wait [#allocation5], 64  }
  0x29   :  { %1410 = vsyncadd [#allocation5], 4294967232 }
  0x2a   :  { %61 = sfence }
  0x2b   :  { %v64_v0 = vld [vmem:[%s2326_s1] sm:$0xff]  ;;  %v1418_v2 = vmov 0   ;;  %v1419_v4 = vmov 1   ;;  %v1420_v5 = vmov 2   ;;  %v1421_v6 = vmov 3   ;;  %v1477_v11 = vld [vmem:[#allocation2 + $0x8] sm:$0xff] }
  0x2c   :  { %v62_v1 = vld [vmem:[%s2325_s0] sm:$0xff]  ;;  %1328 = vset.pattern.permute.xlu1 %v1418_v2  ;;  %1327 = vset.pattern.permute.xlu0 %v1418_v2  ;;  %v2331_v7 = vlaneseq  ;;  %v1482_v13 = vld [vmem:[#allocation2 + $0x10] sm:$0xff]  ;;  %vm158_vm0 = vcmask 1041409   ;;  %v1492_v18 = vld [vmem:[#allocation2 + $0x18] sm:$0xff]  ;;  %vm160_vm1 = vcmask 1042434   ;;  %vm162_vm2 = vcmask 1043459  }
  0x2d   :  { %792 = vperm.xlu1 %1328, %v64_v0   ;;  %83 = vperm.xlu0 %1327, %v62_v1   ;;  %v63_v3 = vsub.f32 1.0, %v62_v1  ;;  %v1475_v10 = vld [vmem:[#allocation2] sm:$0xff]  ;;  %v1506_v26 = vld [vmem:[#allocation6 + $0x8] sm:$0xff]  ;;  %v1516_v32 = vld [vmem:[#allocation6 + $0x10] sm:$0xff]  ;;  %vm164_vm3 = vcmask 1044484   ;;  %vm166_vm4 = vcmask 1045509  }
  0x2e   :  { %v1470_v8 = vshrl.u32 %v2331_v7, 7  ;;  %v1499_v22 = vld [vmem:[#allocation2 + $0x20] sm:$0xff]  ;;  %v1511_v29 = vld [vmem:[#allocation2 + $0x28] sm:$0xff]  ;;  %vm168_vm5 = vcmask 1046534   ;;  %v1525_v37 = vld [vmem:[#allocation2 + $0x30] sm:$0xff]  ;;  %vm170_vm6 = vcmask 1047559  }
  0x2f   :  { %v1504_v25 = vld [vmem:[#allocation6] sm:$0xff]  ;;  %v1533_v41 = vld [vmem:[#allocation6 + $0x18] sm:$0xff]  ;;  %s1542_s0 = sld [smem:[#allocation8]]  ;;  %s1423_s25 = smov [#allocation9]  }
  0x30   :  { %v1473_v9 = vsub.s32 0, %v1470_v8  ;;  %v1480_v12 = vsub.s32 4, %v1470_v8  ;;  %v1531_v40 = vsub.s32 1, %v1470_v8  ;;  %v1548_v48 = vsub.s32 5, %v1470_v8  ;;  %v1553_v50 = vld [vmem:[#allocation2 + $0x38] sm:$0xff]  ;;  %v1563_v55 = vld [vmem:[#allocation6 + $0x20] sm:$0xff] }
  0x31   :  { %1329 = vset.pattern.permute.xlu1 %v1419_v4  ;;  %185 = vperm.xlu0 %1327, %v63_v3   ;;  %v1551_v49 = vsub.s32 2, %v1470_v8  ;;  %v1561_v54 = vsub.s32 6, %v1470_v8  ;;  %v1578_v63 = vsub.f32 %v1475_v10, %v1504_v25  ;;  %v1587_v4 = vld [vmem:[#allocation6 + $0x28] sm:$0xff]  ;;  %s1679_s1 = sld [smem:[#allocation8 + $0x80]]  ;;  %s1290_s26 = sshll.u32 %s1423_s25, 4  ;;  %s1291_s26 = int_to_ptr.vmem [resolvable:$true] %s1290_s26 }
  0x32   :  { %912 = vperm.xlu1 %1329, %v64_v0   ;;  %v97_v14 = vrot.slane %v1475_v10, %v1473_v9  ;;  %v105_v15 = vrot.slane %v1477_v11, %v1473_v9  ;;  %v101_v16 = vrot.slane %v1475_v10, %v1480_v12  ;;  %v109_v17 = vrot.slane %v1477_v11, %v1480_v12  ;;  %s1689_s11 = sld [smem:[#allocation8 + $0x1]]  ;;  %s1385_s27 = scalar_lea.vmem %s1291_s26, 32 }
  0x33   :  { %v113_v19 = vrot.slane %v1482_v13, %v1473_v9  ;;  %v117_v21 = vrot.slane %v1482_v13, %v1480_v12  ;;  %v121_v23 = vrot.slane %v1492_v18, %v1473_v9  ;;  %v125_v28 = vrot.slane %v1492_v18, %v1480_v12  ;;  %s1700_s12 = sld [smem:[#allocation8 + $0x81]]  ;;  %p1386_p1 = scmp.ne.s32.totalorder %s1291_s26, %s1385_s27 }
  0x34   :  { %v159_v20 = vsel %vm158_vm0, %v105_v15, %v97_v14  ;;  %v172_v24 = vsel %vm158_vm0, %v109_v17, %v101_v16  ;;  %v129_v30 = vrot.slane %v1499_v22, %v1473_v9  ;;  %v199_v34 = vrot.slane %v1504_v25, %v1473_v9  ;;  %s1901_s13 = sld [smem:[#allocation8 + $0x100]]  ;;  %p1390_p2 = scmp.lt.s32.totalorder %s1291_s26, %s1291_s26 }
  0x35   :  { %1330 = vset.pattern.permute.xlu0 %v1420_v5  ;;  %v161_v27 = vsel %vm160_vm1, %v113_v19, %v159_v20  ;;  %v173_v31 = vsel %vm160_vm1, %v117_v21, %v172_v24  ;;  %v207_v35 = vrot.slane %v1506_v26, %v1473_v9  ;;  %v133_v36 = vrot.slane %v1499_v22, %v1480_v12  ;;  %s1909_s14 = sld [smem:[#allocation8 + $0x180]]  ;;  %p1391_p3 = scmp.lt.s32.totalorder %s1385_s27, %s1385_s27 }
  0x36   :  { %1331 = vset.pattern.permute.xlu1 %v1421_v6  ;;  %1026 = vperm.xlu0 %1330, %v64_v0   ;;  %v163_v33 = vsel %vm162_vm2, %v121_v23, %v161_v27  ;;  %v137_v38 = vrot.slane %v1511_v29, %v1473_v9  ;;  %v174_v39 = vsel %vm162_vm2, %v125_v28, %v173_v31  ;;  %v787_v27 = vstv %s1542_s0  ;;  %v1607_v28 = vld [vmem:[#allocation6 + $0x30] sm:$0xff]  ;;  %s1917_s15 = sld [smem:[#allocation8 + $0x101]] }
  0x37   :  { %1140 = vperm.xlu1 %1331, %v64_v0   ;;  %v165_v42 = vsel %vm164_vm3, %v129_v30, %v163_v33  ;;  %v203_v43 = vrot.slane %v1504_v25, %v1480_v12  ;;  %v211_v44 = vrot.slane %v1506_v26, %v1480_v12  ;;  %v215_v45 = vrot.slane %v1516_v32, %v1473_v9  ;;  %s1925_s16 = sld [smem:[#allocation8 + $0x181]]  ;;  %p1392_p4 = por %p1391_p3, %p1390_p2 }
  0x38   :  { %v141_v46 = vrot.slane %v1511_v29, %v1480_v12  ;;  %v260_v47 = vsel %vm158_vm0, %v207_v35, %v199_v34  ;;  %v145_v51 = vrot.slane %v1525_v37, %v1473_v9  ;;  %v175_v52 = vsel %vm164_vm3, %v133_v36, %v174_v39  ;;  %s1927_s17 = sld [smem:[#allocation8 + $0x3]] }
  0x39   :  { %v219_v53 = vrot.slane %v1516_v32, %v1480_v12  ;;  %v167_v56 = vsel %vm166_vm4, %v137_v38, %v165_v42  ;;  %v223_v57 = vrot.slane %v1533_v41, %v1473_v9  ;;  %v283_v58 = vrot.slane %v1475_v10, %v1531_v40  ;;  %s1949_s18 = sld [smem:[#allocation8 + $0x83]]  ;;  %p1393_p5 = pnand %p1392_p4, %p1386_p1 }
  0x3a   :  { %1332 = vset.pattern.permute.xlu0 %v1421_v6  ;;  %v291_v59 = vrot.slane %v1477_v11, %v1531_v40  ;;  %v149_v60 = vrot.slane %v1525_v37, %v1480_v12  ;;  %v261_v61 = vsel %vm160_vm1, %v215_v45, %v260_v47  ;;  %v267_v62 = vsel %vm158_vm0, %v211_v44, %v203_v43  ;;  %s1963_s19 = sld [smem:[#allocation8 + $0x103]] }
  0x3b   :  { %v153_v0 = vrot.slane %v1553_v50, %v1473_v9  ;;  %v176_v1 = vsel %vm166_vm4, %v141_v46, %v175_v52  ;;  %v287_v2 = vrot.slane %v1475_v10, %v1548_v48  ;;  %v295_v3 = vrot.slane %v1477_v11, %v1548_v48  ;;  %s1968_s20 = sld [smem:[#allocation8 + $0x183]] }
  0x3c   :  { %v169_v5 = vsel %vm168_vm5, %v145_v51, %v167_v56  ;;  %v227_v6 = vrot.slane %v1533_v41, %v1480_v12  ;;  %v231_v14 = vrot.slane %v1563_v55, %v1473_v9  ;;  %v299_v15 = vrot.slane %v1482_v13, %v1531_v40  ;;  %s1980_s21 = sld [smem:[#allocation8 + $0x2]] }
  0x3d   :  { %v157_v16 = vrot.slane %v1553_v50, %v1480_v12  ;;  %v262_v17 = vsel %vm162_vm2, %v223_v57, %v261_v61  ;;  %v268_v19 = vsel %vm160_vm1, %v219_v53, %v267_v62  ;;  %v344_v20 = vsel %vm158_vm0, %v291_v59, %v283_v58  ;;  %v1638_v53 = vld [vmem:[#allocation6 + $0x38] sm:$0xff]  ;;  %s1994_s22 = sld [smem:[#allocation8 + $0x82]] }
  0x3e   :  { %v177_v21 = vsel %vm168_vm5, %v149_v60, %v176_v1  ;;  %v235_v23 = vrot.slane %v1563_v55, %v1480_v12  ;;  %v303_v24 = vrot.slane %v1482_v13, %v1548_v48  ;;  %v1610_v30 = vsel %vm170_vm6, %v153_v0, %v169_v5  ;;  %s2126_s23 = sld [smem:[#allocation8 + $0x102]] }
  0x3f   :  { %v239_v31 = vrot.slane %v1587_v4, %v1473_v9  ;;  %v307_v33 = vrot.slane %v1492_v18, %v1531_v40  ;;  %v351_v34 = vsel %vm158_vm0, %v295_v3, %v287_v2  ;;  %v263_v35 = vsel %vm164_vm3, %v231_v14, %v262_v17  ;;  %s2134_s24 = sld [smem:[#allocation8 + $0x182]] }
  0x40   :  { %v269_v36 = vsel %vm162_vm2, %v227_v6, %v268_v19  ;;  %v311_v38 = vrot.slane %v1492_v18, %v1548_v48  ;;  %v345_v39 = vsel %vm160_vm1, %v299_v15, %v344_v20  ;;  %v365_v42 = vrot.slane %v1504_v25, %v1531_v40 }
  0x41   :  { %v369_v43 = vrot.slane %v1504_v25, %v1548_v48  ;;  %v373_v44 = vrot.slane %v1506_v26, %v1531_v40  ;;  %v377_v45 = vrot.slane %v1506_v26, %v1548_v48  ;;  %v1631_v46 = vsel %vm170_vm6, %v157_v16, %v177_v21 }
  0x42   :  { %v247_v47 = vrot.slane %v1607_v28, %v1473_v9  ;;  %v315_v51 = vrot.slane %v1499_v22, %v1531_v40  ;;  %v352_v52 = vsel %vm160_vm1, %v303_v24, %v351_v34  ;;  %v243_v56 = vrot.slane %v1587_v4, %v1480_v12 }
  0x43   :  { %v251_v57 = vrot.slane %v1607_v28, %v1480_v12  ;;  %v264_v58 = vsel %vm166_vm4, %v239_v31, %v263_v35  ;;  %v346_v59 = vsel %vm162_vm2, %v307_v33, %v345_v39  ;;  %v270_v60 = vsel %vm164_vm3, %v235_v23, %v269_v36 }
  0x44   :  { %v319_v61 = vrot.slane %v1499_v22, %v1548_v48  ;;  %v381_v62 = vrot.slane %v1516_v32, %v1531_v40  ;;  %v385_v0 = vrot.slane %v1516_v32, %v1548_v48  ;;  %v323_v1 = vrot.slane %v1511_v29, %v1531_v40 }
  0x45   :  { %v353_v2 = vsel %vm162_vm2, %v311_v38, %v352_v52  ;;  %v426_v3 = vsel %vm158_vm0, %v373_v44, %v365_v42  ;;  %v433_v5 = vsel %vm158_vm0, %v377_v45, %v369_v43  ;;  %v255_v6 = vrot.slane %v1638_v53, %v1473_v9 }
  0x46   :  { %v259_v14 = vrot.slane %v1638_v53, %v1480_v12  ;;  %v265_v15 = vsel %vm168_vm5, %v247_v47, %v264_v58  ;;  %v347_v16 = vsel %vm164_vm3, %v315_v51, %v346_v59  ;;  %v271_v17 = vsel %vm166_vm4, %v243_v56, %v270_v60 }
  0x47   :  { %v327_v19 = vrot.slane %v1511_v29, %v1548_v48  ;;  %v389_v20 = vrot.slane %v1533_v41, %v1531_v40  ;;  %v393_v21 = vrot.slane %v1533_v41, %v1548_v48  ;;  %v331_v23 = vrot.slane %v1525_v37, %v1531_v40 }
  0x48   :  { %v354_v24 = vsel %vm164_vm3, %v319_v61, %v353_v2  ;;  %v427_v31 = vsel %vm160_vm1, %v381_v62, %v426_v3  ;;  %v434_v33 = vsel %vm160_vm1, %v385_v0, %v433_v5  ;;  %v335_v34 = vrot.slane %v1525_v37, %v1548_v48 }
  0x49   :  { %v348_v35 = vsel %vm166_vm4, %v323_v1, %v347_v16  ;;  %v449_v36 = vrot.slane %v1475_v10, %v1551_v49  ;;  %v457_v38 = vrot.slane %v1477_v11, %v1551_v49  ;;  %v397_v39 = vrot.slane %v1563_v55, %v1531_v40 }
  0x4a   :  { %v401_v42 = vrot.slane %v1563_v55, %v1548_v48  ;;  %v453_v43 = vrot.slane %v1475_v10, %v1561_v54  ;;  %v461_v44 = vrot.slane %v1477_v11, %v1561_v54  ;;  %v339_v45 = vrot.slane %v1553_v50, %v1531_v40 }
  0x4b   :  { %v355_v47 = vsel %vm166_vm4, %v327_v19, %v354_v24  ;;  %v428_v51 = vsel %vm162_vm2, %v389_v20, %v427_v31  ;;  %v435_v52 = vsel %vm162_vm2, %v393_v21, %v434_v33  ;;  %v272_v56 = vsel %vm168_vm5, %v251_v57, %v271_v17 }
  0x4c   :  { %v343_v58 = vrot.slane %v1553_v50, %v1548_v48  ;;  %v349_v59 = vsel %vm168_vm5, %v331_v23, %v348_v35  ;;  %v465_v60 = vrot.slane %v1482_v13, %v1551_v49  ;;  %v405_v61 = vrot.slane %v1587_v4, %v1531_v40 }
  0x4d   :  { %v409_v62 = vrot.slane %v1587_v4, %v1548_v48  ;;  %v469_v0 = vrot.slane %v1482_v13, %v1561_v54  ;;  %v510_v1 = vsel %vm158_vm0, %v457_v38, %v449_v36  ;;  %v356_v57 = vsel %vm168_vm5, %v335_v34, %v355_v47 }
  0x4e   :  { %v429_v2 = vsel %vm164_vm3, %v397_v39, %v428_v51  ;;  %v436_v3 = vsel %vm164_vm3, %v401_v42, %v435_v52  ;;  %v517_v5 = vsel %vm158_vm0, %v461_v44, %v453_v43  ;;  %v1720_v16 = vsel %vm170_vm6, %v255_v6, %v265_v15 }
  0x4f   :  { %v1723_v17 = vsel %vm170_vm6, %v259_v14, %v272_v56  ;;  %v1726_v19 = vsel %vm170_vm6, %v339_v45, %v349_v59  ;;  %v473_v20 = vrot.slane %v1492_v18, %v1551_v49  ;;  %v413_v21 = vrot.slane %v1607_v28, %v1531_v40 }
  0x50   :  { %v417_v23 = vrot.slane %v1607_v28, %v1548_v48  ;;  %v477_v6 = vrot.slane %v1492_v18, %v1561_v54  ;;  %v511_v15 = vsel %vm160_vm1, %v465_v60, %v510_v1  ;;  %v1738_v14 = vsel %vm170_vm6, %v343_v58, %v356_v57 }
  0x51   :  { %v430_v24 = vsel %vm166_vm4, %v405_v61, %v429_v2  ;;  %v437_v31 = vsel %vm166_vm4, %v409_v62, %v436_v3  ;;  %v518_v33 = vsel %vm160_vm1, %v469_v0, %v517_v5  ;;  %v421_v34 = vrot.slane %v1638_v53, %v1531_v40 }
  0x52   :  { %v425_v35 = vrot.slane %v1638_v53, %v1548_v48  ;;  %v481_v38 = vrot.slane %v1499_v22, %v1551_v49  ;;  %v485_v43 = vrot.slane %v1499_v22, %v1561_v54  ;;  %v512_v44 = vsel %vm162_vm2, %v473_v20, %v511_v15 }
  0x53   :  { %v431_v45 = vsel %vm168_vm5, %v413_v21, %v430_v24  ;;  %v438_v47 = vsel %vm168_vm5, %v417_v23, %v437_v31  ;;  %v519_v51 = vsel %vm162_vm2, %v477_v6, %v518_v33  ;;  %v1759_v52 = vsub.s32 3, %v1470_v8 }
  0x54   :  { %v489_v56 = vrot.slane %v1511_v29, %v1551_v49  ;;  %v493_v58 = vrot.slane %v1511_v29, %v1561_v54  ;;  %v531_v59 = vrot.slane %v1504_v25, %v1551_v49  ;;  %v539_v60 = vrot.slane %v1506_v26, %v1551_v49 }
  0x55   :  { %v513_v61 = vsel %vm164_vm3, %v481_v38, %v512_v44  ;;  %v535_v62 = vrot.slane %v1504_v25, %v1561_v54  ;;  %v543_v0 = vrot.slane %v1506_v26, %v1561_v54  ;;  %v1775_v1 = vsub.s32 7, %v1470_v8 }
  0x56   :  { %v1778_v57 = vsel %vm170_vm6, %v421_v34, %v431_v45  ;;  %v1781_v2 = vsel %vm170_vm6, %v425_v35, %v438_v47  ;;  %v497_v3 = vrot.slane %v1525_v37, %v1551_v49  ;;  %v520_v5 = vsel %vm164_vm3, %v485_v43, %v519_v51 }
  0x57   :  { %v501_v20 = vrot.slane %v1525_v37, %v1561_v54  ;;  %v547_v21 = vrot.slane %v1516_v32, %v1551_v49  ;;  %v615_v23 = vrot.slane %v1475_v10, %v1759_v52  ;;  %v623_v6 = vrot.slane %v1477_v11, %v1759_v52 }
  0x58   :  { %v505_v15 = vrot.slane %v1553_v50, %v1551_v49  ;;  %v514_v24 = vsel %vm166_vm4, %v489_v56, %v513_v61  ;;  %v551_v31 = vrot.slane %v1516_v32, %v1561_v54  ;;  %v592_v33 = vsel %vm158_vm0, %v539_v60, %v531_v59 }
  0x59   :  { %v521_v34 = vsel %vm166_vm4, %v493_v58, %v520_v5  ;;  %v599_v35 = vsel %vm158_vm0, %v543_v0, %v535_v62  ;;  %v619_v38 = vrot.slane %v1475_v10, %v1775_v1  ;;  %v627_v43 = vrot.slane %v1477_v11, %v1775_v1 }
  0x5a   :  { %v509_v44 = vrot.slane %v1553_v50, %v1561_v54  ;;  %v555_v45 = vrot.slane %v1533_v41, %v1551_v49  ;;  %v559_v47 = vrot.slane %v1533_v41, %v1561_v54  ;;  %v631_v51 = vrot.slane %v1482_v13, %v1759_v52 }
  0x5b   :  { %v563_v56 = vrot.slane %v1563_v55, %v1551_v49  ;;  %v567_v10 = vrot.slane %v1563_v55, %v1561_v54  ;;  %v593_v58 = vsel %vm160_vm1, %v547_v21, %v592_v33  ;;  %v676_v59 = vsel %vm158_vm0, %v623_v6, %v615_v23 }
  0x5c   :  { %v515_v60 = vsel %vm168_vm5, %v497_v3, %v514_v24  ;;  %v1822_v61 = vsel %vm168_vm5, %v501_v20, %v521_v34  ;;  %v600_v62 = vsel %vm160_vm1, %v551_v31, %v599_v35  ;;  %v635_v0 = vrot.slane %v1482_v13, %v1775_v1 }
  0x5d   :  { %v639_v5 = vrot.slane %v1492_v18, %v1759_v52  ;;  %v683_v7 = vsel %vm158_vm0, %v627_v43, %v619_v38  ;;  %v697_v21 = vrot.slane %v1504_v25, %v1759_v52  ;;  %v705_v23 = vrot.slane %v1506_v26, %v1759_v52 }
  0x5e   :  { %v571_v3 = vrot.slane %v1587_v4, %v1551_v49  ;;  %v575_v20 = vrot.slane %v1587_v4, %v1561_v54  ;;  %v594_v6 = vsel %vm162_vm2, %v555_v45, %v593_v58  ;;  %v677_v24 = vsel %vm160_vm1, %v631_v51, %v676_v59 }
  0x5f   :  { %v601_v31 = vsel %vm162_vm2, %v559_v47, %v600_v62  ;;  %v643_v33 = vrot.slane %v1492_v18, %v1775_v1  ;;  %v701_v34 = vrot.slane %v1504_v25, %v1775_v1  ;;  %v709_v35 = vrot.slane %v1506_v26, %v1775_v1 }
  0x60   :  { %v1848_v38 = vsel %vm170_vm6, %v505_v15, %v515_v60  ;;  %v647_v43 = vrot.slane %v1499_v22, %v1759_v52  ;;  %v684_v45 = vsel %vm160_vm1, %v635_v0, %v683_v7  ;;  %v713_v47 = vrot.slane %v1516_v32, %v1759_v52 }
  0x61   :  { %v579_v51 = vrot.slane %v1607_v28, %v1551_v49  ;;  %v583_v25 = vrot.slane %v1607_v28, %v1561_v54  ;;  %v678_v58 = vsel %vm162_vm2, %v639_v5, %v677_v24  ;;  %v758_v59 = vsel %vm158_vm0, %v705_v23, %v697_v21 }
  0x62   :  { %v595_v15 = vsel %vm164_vm3, %v563_v56, %v594_v6  ;;  %v602_v60 = vsel %vm164_vm3, %v567_v10, %v601_v31  ;;  %v651_v7 = vrot.slane %v1499_v22, %v1775_v1  ;;  %v717_v62 = vrot.slane %v1516_v32, %v1775_v1 }
  0x63   :  { %v655_v0 = vrot.slane %v1511_v29, %v1759_v52  ;;  %v685_v42 = vsel %vm162_vm2, %v643_v33, %v684_v45  ;;  %v721_v5 = vrot.slane %v1533_v41, %v1759_v52  ;;  %v765_v21 = vsel %vm158_vm0, %v709_v35, %v701_v34 }
  0x64   :  { %v587_v56 = vrot.slane %v1638_v53, %v1551_v49  ;;  %v591_v10 = vrot.slane %v1638_v53, %v1561_v54  ;;  %v679_v23 = vsel %vm164_vm3, %v647_v43, %v678_v58  ;;  %v759_v6 = vsel %vm160_vm1, %v713_v47, %v758_v59 }
  0x65   :  { %v596_v24 = vsel %vm166_vm4, %v571_v3, %v595_v15  ;;  %v603_v31 = vsel %vm166_vm4, %v575_v20, %v602_v60  ;;  %v659_v33 = vrot.slane %v1511_v29, %v1775_v1  ;;  %v725_v34 = vrot.slane %v1533_v41, %v1775_v1 }
  0x66   :  { %v663_v35 = vrot.slane %v1525_v37, %v1759_v52  ;;  %v686_v45 = vsel %vm164_vm3, %v651_v7, %v685_v42  ;;  %v729_v43 = vrot.slane %v1563_v55, %v1759_v52  ;;  %v766_v47 = vsel %vm160_vm1, %v717_v62, %v765_v21 }
  0x67   :  { %v680_v3 = vsel %vm166_vm4, %v655_v0, %v679_v23  ;;  %v760_v20 = vsel %vm162_vm2, %v721_v5, %v759_v6  ;;  %v1895_v58 = vsub.f32 %v1477_v11, %v1506_v26  ;;  %v1899_v59 = vsub.f32 %v1482_v13, %v1516_v32 }
  0x68   :  { %v597_v42 = vsel %vm168_vm5, %v579_v51, %v596_v24  ;;  %v604_v15 = vsel %vm168_vm5, %v583_v25, %v603_v31  ;;  %v667_v60 = vrot.slane %v1525_v37, %v1775_v1  ;;  %v733_v7 = vrot.slane %v1563_v55, %v1775_v1 }
  0x69   :  { %v671_v11 = vrot.slane %v1553_v50, %v1759_v52  ;;  %v675_v13 = vrot.slane %v1553_v50, %v1775_v1  ;;  %v687_v26 = vsel %vm166_vm4, %v659_v33, %v686_v45  ;;  %v767_v32 = vsel %vm162_vm2, %v725_v34, %v766_v47 }
  0x6a   :  { %v681_v51 = vsel %vm168_vm5, %v663_v35, %v680_v3  ;;  %v737_v25 = vrot.slane %v1587_v4, %v1759_v52  ;;  %v741_v62 = vrot.slane %v1587_v4, %v1775_v1  ;;  %v761_v0 = vsel %vm164_vm3, %v729_v43, %v760_v20 }
  0x6b   :  { %v1166_v5 = vrot.slane %v1578_v63, %v1759_v52  ;;  %v1170_v21 = vrot.slane %v1578_v63, %v1775_v1  ;;  %v1174_v23 = vrot.slane %v1895_v58, %v1759_v52  ;;  %v1178_v6 = vrot.slane %v1895_v58, %v1775_v1 }
  0x6c   :  { %v1942_v24 = vsel %vm170_vm6, %v509_v44, %v1822_v61  ;;  %v1945_v31 = vsel %vm170_vm6, %v587_v56, %v597_v42  ;;  %v688_v33 = vsel %vm168_vm5, %v667_v60, %v687_v26  ;;  %v768_v34 = vsel %vm164_vm3, %v733_v7, %v767_v32 }
  0x6d   :  { %v1952_v35 = vsel %vm170_vm6, %v591_v10, %v604_v15  ;;  %v1955_v45 = vsel %vm170_vm6, %v671_v11, %v681_v51  ;;  %v745_v43 = vrot.slane %v1607_v28, %v1759_v52  ;;  %v1961_v44 = vsub.f32 %v1492_v18, %v1533_v41 }
  0x6e   :  { %v749_v61 = vrot.slane %v1607_v28, %v1775_v1  ;;  %v762_v56 = vsel %vm166_vm4, %v737_v25, %v761_v0  ;;  %v1182_v10 = vrot.slane %v1899_v59, %v1759_v52  ;;  %v1186_v47 = vrot.slane %v1899_v59, %v1775_v1 }
  0x6f   :  { %v1975_v3 = vsel %vm170_vm6, %v675_v13, %v688_v33  ;;  %v769_v18 = vsel %vm166_vm4, %v741_v62, %v768_v34  ;;  %v1227_v41 = vsel %vm158_vm0, %v1174_v23, %v1166_v5  ;;  %v1234_v20 = vsel %vm158_vm0, %v1178_v6, %v1170_v21 }
  0x70   :  { %v753_v42 = vrot.slane %v1638_v53, %v1759_v52  ;;  %v757_v15 = vrot.slane %v1638_v53, %v1775_v1  ;;  %v1988_v60 = vsub.f32 %v1499_v22, %v1563_v55  ;;  %v1992_v7 = vsub.f32 %v1511_v29, %v1587_v4 }
  0x71   :  { %v763_v11 = vsel %vm168_vm5, %v745_v43, %v762_v56  ;;  %v1999_v13 = vsub.f32 %v1525_v37, %v1607_v28  ;;  %v1190_v26 = vrot.slane %v1961_v44, %v1759_v52  ;;  %v1194_v22 = vrot.slane %v1961_v44, %v1775_v1 }
  0x72   :  { %v770_v55 = vsel %vm168_vm5, %v749_v61, %v769_v18  ;;  %v2008_v29 = vsub.f32 %v1553_v50, %v1638_v53  ;;  %v1228_v4 = vsel %vm160_vm1, %v1182_v10, %v1227_v41  ;;  %v1235_v37 = vsel %vm160_vm1, %v1186_v47, %v1234_v20 }
  0x73   :  { %v2017_v62 = vsel %vm170_vm6, %v753_v42, %v763_v11  ;;  %v1198_v5 = vrot.slane %v1988_v60, %v1759_v52  ;;  %v1202_v50 = vrot.slane %v1988_v60, %v1775_v1  ;;  %v2025_v53 = vsel %vm170_vm6, %v757_v15, %v770_v55 }
  0x74   :  { %v1229_v23 = vsel %vm162_vm2, %v1190_v26, %v1228_v4  ;;  %v1236_v6 = vsel %vm162_vm2, %v1194_v22, %v1235_v37  ;;  %v1206_v43 = vrot.slane %v1992_v7, %v1759_v52  ;;  %v1210_v61 = vrot.slane %v1992_v7, %v1775_v1 }
  0x75   :  { %v1214_v56 = vrot.slane %v1999_v13, %v1759_v52  ;;  %v1218_v10 = vrot.slane %v1999_v13, %v1775_v1  ;;  %v1222_v47 = vrot.slane %v2008_v29, %v1759_v52  ;;  %v1226_v18 = vrot.slane %v2008_v29, %v1775_v1 }
  0x76   :  { %v1230_v41 = vsel %vm164_vm3, %v1198_v5, %v1229_v23  ;;  %v1237_v20 = vsel %vm164_vm3, %v1202_v50, %v1236_v6  ;;  %v826_v11 = vrot.slane %v1578_v63, %v1473_v9  ;;  %v830_v26 = vrot.slane %v1578_v63, %v1480_v12 }
  0x77   :  { %v834_v22 = vrot.slane %v1895_v58, %v1473_v9  ;;  %v838_v55 = vrot.slane %v1895_v58, %v1480_v12  ;;  %v938_v4 = vrot.slane %v1578_v63, %v1531_v40  ;;  %v942_v37 = vrot.slane %v1578_v63, %v1548_v48 }
  0x78   :  { %v946_v5 = vrot.slane %v1895_v58, %v1531_v40  ;;  %v950_v50 = vrot.slane %v1895_v58, %v1548_v48  ;;  %v1052_v23 = vrot.slane %v1578_v63, %v1551_v49  ;;  %v1056_v6 = vrot.slane %v1578_v63, %v1561_v54 }
  0x79   :  { %v1060_v15 = vrot.slane %v1895_v58, %v1551_v49  ;;  %v1064_v42 = vrot.slane %v1895_v58, %v1561_v54  ;;  %v1231_v34 = vsel %vm166_vm4, %v1206_v43, %v1230_v41  ;;  %v1238_v33 = vsel %vm166_vm4, %v1210_v61, %v1237_v20 }
  0x7a   :  { %v1068_v21 = vrot.slane %v1899_v59, %v1551_v49  ;;  %v1072_v0 = vrot.slane %v1899_v59, %v1561_v54  ;;  %v842_v25 = vrot.slane %v1899_v59, %v1473_v9  ;;  %v846_v63 = vrot.slane %v1899_v59, %v1480_v12 }
  0x7b   :  { %v954_v51 = vrot.slane %v1899_v59, %v1531_v40  ;;  %v958_v58 = vrot.slane %v1899_v59, %v1548_v48  ;;  %v887_v43 = vsel %vm158_vm0, %v834_v22, %v826_v11  ;;  %v894_v61 = vsel %vm158_vm0, %v838_v55, %v830_v26 }
  0x7c   :  { %v999_v41 = vsel %vm158_vm0, %v946_v5, %v938_v4  ;;  %v1006_v20 = vsel %vm158_vm0, %v950_v50, %v942_v37  ;;  %v1076_v32 = vrot.slane %v1961_v44, %v1551_v49  ;;  %v1080_v28 = vrot.slane %v1961_v44, %v1561_v54 }
  0x7d   :  { %v1113_v39 = vsel %vm158_vm0, %v1060_v15, %v1052_v23  ;;  %v1120_v36 = vsel %vm158_vm0, %v1064_v42, %v1056_v6  ;;  %v850_v59 = vrot.slane %v1961_v44, %v1473_v9  ;;  %v854_v11 = vrot.slane %v1961_v44, %v1480_v12 }
  0x7e   :  { %v962_v26 = vrot.slane %v1961_v44, %v1531_v40  ;;  %v966_v22 = vrot.slane %v1961_v44, %v1548_v48  ;;  %v888_v55 = vsel %vm160_vm1, %v842_v25, %v887_v43  ;;  %v895_v4 = vsel %vm160_vm1, %v846_v63, %v894_v61 }
  0x7f   :  { %v1000_v15 = vsel %vm160_vm1, %v954_v51, %v999_v41  ;;  %v1007_v42 = vsel %vm160_vm1, %v958_v58, %v1006_v20  ;;  %v1084_v37 = vrot.slane %v1988_v60, %v1551_v49  ;;  %v1088_v5 = vrot.slane %v1988_v60, %v1561_v54 }
  0x80   :  { %v1114_v50 = vsel %vm160_vm1, %v1068_v21, %v1113_v39  ;;  %v1121_v23 = vsel %vm160_vm1, %v1072_v0, %v1120_v36  ;;  %v858_v44 = vrot.slane %v1988_v60, %v1473_v9  ;;  %v862_v25 = vrot.slane %v1988_v60, %v1480_v12 }
  0x81   :  { %v970_v51 = vrot.slane %v1988_v60, %v1531_v40  ;;  %v974_v6 = vrot.slane %v1988_v60, %v1548_v48  ;;  %v889_v63 = vsel %vm162_vm2, %v850_v59, %v888_v55  ;;  %v896_v58 = vsel %vm162_vm2, %v854_v11, %v895_v4 }
  0x82   :  { %v1001_v39 = vsel %vm162_vm2, %v962_v26, %v1000_v15  ;;  %v1008_v36 = vsel %vm162_vm2, %v966_v22, %v1007_v42  ;;  %v1092_v0 = vrot.slane %v1992_v7, %v1551_v49  ;;  %v1096_v21 = vrot.slane %v1992_v7, %v1561_v54 }
  0x83   :  { %v1115_v43 = vsel %vm162_vm2, %v1076_v32, %v1114_v50  ;;  %v1122_v60 = vsel %vm162_vm2, %v1080_v28, %v1121_v23  ;;  %v866_v61 = vrot.slane %v1992_v7, %v1473_v9  ;;  %v870_v41 = vrot.slane %v1992_v7, %v1480_v12 }
  0x84   :  { %v978_v20 = vrot.slane %v1992_v7, %v1531_v40  ;;  %v982_v59 = vrot.slane %v1992_v7, %v1548_v48  ;;  %v890_v11 = vsel %vm164_vm3, %v858_v44, %v889_v63  ;;  %v897_v32 = vsel %vm164_vm3, %v862_v25, %v896_v58 }
  0x85   :  { %v1002_v28 = vsel %vm164_vm3, %v970_v51, %v1001_v39  ;;  %v1009_v26 = vsel %vm164_vm3, %v974_v6, %v1008_v36  ;;  %v1232_v22 = vsel %vm168_vm5, %v1214_v56, %v1231_v34  ;;  %v1239_v55 = vsel %vm168_vm5, %v1218_v10, %v1238_v33 }
  0x86   :  { %v1116_v7 = vsel %vm164_vm3, %v1084_v37, %v1115_v43  ;;  %v1123_v4 = vsel %vm164_vm3, %v1088_v5, %v1122_v60  ;;  %v874_v15 = vrot.slane %v1999_v13, %v1473_v9  ;;  %v878_v42 = vrot.slane %v1999_v13, %v1480_v12 }
  0x87   :  { %v986_v50 = vrot.slane %v1999_v13, %v1531_v40  ;;  %v990_v34 = vrot.slane %v1999_v13, %v1548_v48  ;;  %v891_v56 = vsel %vm166_vm4, %v866_v61, %v890_v11  ;;  %v898_v33 = vsel %vm166_vm4, %v870_v41, %v897_v32 }
  0x88   :  { %v1003_v10 = vsel %vm166_vm4, %v978_v20, %v1002_v28  ;;  %v1010_v37 = vsel %vm166_vm4, %v982_v59, %v1009_v26  ;;  %v1100_v5 = vrot.slane %v1999_v13, %v1551_v49  ;;  %v1104_v23 = vrot.slane %v1999_v13, %v1561_v54 }
  0x89   :  { %v1117_v44 = vsel %vm166_vm4, %v1092_v0, %v1116_v7  ;;  %v1124_v25 = vsel %vm166_vm4, %v1096_v21, %v1123_v4  ;;  %v882_v51 = vrot.slane %v2008_v29, %v1473_v9  ;;  %v886_v6 = vrot.slane %v2008_v29, %v1480_v12 }
  0x8a   :  { %v994_v63 = vrot.slane %v2008_v29, %v1531_v40  ;;  %v998_v58 = vrot.slane %v2008_v29, %v1548_v48  ;;  %v892_v39 = vsel %vm168_vm5, %v874_v15, %v891_v56  ;;  %v899_v13 = vsel %vm168_vm5, %v878_v42, %v898_v33 }
  0x8b   :  { %v1004_v36 = vsel %vm168_vm5, %v986_v50, %v1003_v10  ;;  %v1011_v0 = vsel %vm168_vm5, %v990_v34, %v1010_v37  ;;  %v2192_v9 = vsel %vm170_vm6, %v1222_v47, %v1232_v22  ;;  %v2198_v12 = vsel %vm170_vm6, %v1226_v18, %v1239_v55 }
  0x8c   :  { %v1038_v40 = vstv %s2126_s23  ;;  %v1044_v48 = vstv %s2134_s24  ;;  %v1108_v43 = vrot.slane %v2008_v29, %v1551_v49  ;;  %v1112_v60 = vrot.slane %v2008_v29, %v1561_v54 }
  0x8d   :  { %v2207_v61 = vsel %vm168_vm5, %v1100_v5, %v1117_v44  ;;  %v2210_v52 = vsel %vm168_vm5, %v1104_v23, %v1124_v25  ;;  %v2213_v1 = vsel %vm170_vm6, %v882_v51, %v892_v39  ;;  %v2216_v18 = vsel %vm170_vm6, %v886_v6, %v899_v13 }
  0x8e   :  { %v2219_v41 = vsel %vm170_vm6, %v994_v63, %v1004_v36  ;;  %v2222_v20 = vsel %vm170_vm6, %v998_v58, %v1011_v0  ;;  %v2334_v37 = vstv %s1689_s11  ;;  %v2336_v25 = vstv %s1700_s12 }
  0x8f   :  { %v2335_v23 = vmov %v2334_v37  ;;  %v2337_v6 = vmov %v2336_v25  ;;  %v2338_v13 = vstv %s1901_s13 }
  0x90   :  { %v2339_v36 = vmov %v2338_v13 }
  0xa8   :  { %v84_v21 = vpop.permute.xlu0 %83  ;;  %v793_v47 = vpop.permute.xlu1 %792 }
  0xa9   :  { %v181_v59 = vmul.f32 %v1610_v30, %v84_v21  ;;  %v182_v11 = vmul.f32 %v1631_v46, %v84_v21  ;;  %v360_v32 = vmul.f32 %v1726_v19, %v84_v21  ;;  %v361_v28 = vmul.f32 %v1738_v14, %v84_v21 }
  0xaa   :  { %v526_v22 = vmul.f32 %v1848_v38, %v84_v21  ;;  %v527_v55 = vmul.f32 %v1942_v24, %v84_v21  ;;  %v692_v7 = vmul.f32 %v1955_v45, %v84_v21  ;;  %v693_v4 = vmul.f32 %v1975_v3, %v84_v21 }
  0xac   :  { %v186_v26 = vpop.permute.xlu0 %185 }
  0xad   :  { %v276_v15 = vmul.f32 %v1720_v16, %v186_v26  ;;  %v277_v42 = vmul.f32 %v1723_v17, %v186_v26  ;;  %v442_v30 = vmul.f32 %v1778_v57, %v186_v26  ;;  %v443_v46 = vmul.f32 %v1781_v2, %v186_v26  ;;  %v913_v2 = vpop.permute.xlu1 %912 }
  0xae   :  { %v608_v19 = vmul.f32 %v1945_v31, %v186_v26  ;;  %v609_v14 = vmul.f32 %v1952_v35, %v186_v26  ;;  %v774_v38 = vmul.f32 %v2017_v62, %v186_v26  ;;  %v775_v16 = vmul.f32 %v2025_v53, %v186_v26 }
  0xaf   :  { %v278_v17 = vadd.f32 %v276_v15, %v181_v59  ;;  %v279_v24 = vadd.f32 %v277_v42, %v182_v11  ;;  %v444_v57 = vadd.f32 %v442_v30, %v360_v32  ;;  %v445_v45 = vadd.f32 %v443_v46, %v361_v28 }
  0xb0   :  { %v610_v3 = vadd.f32 %v608_v19, %v526_v22  ;;  %v611_v31 = vadd.f32 %v609_v14, %v527_v55  ;;  %v776_v50 = vadd.f32 %v774_v38, %v692_v7  ;;  %v777_v35 = vadd.f32 %v775_v16, %v693_v4 }
  0xb1   :  { %v788_v62 = vmul.f32 %v787_v27, %v278_v17  ;;  %v789_v34 = vmul.f32 %v787_v27, %v279_v24  ;;  %v2332_v53 = vstv %s1679_s1  ;;  %v909_v5 = vmul.f32 %v2334_v37, %v278_v17 }
  0xb2   :  { %v799_v56 = vmul.f32 %v2332_v53, %v444_v57  ;;  %v2333_v33 = vmov %v2332_v53  ;;  %v910_v44 = vmul.f32 %v2335_v23, %v279_v24  ;;  %v919_v51 = vmul.f32 %v2336_v25, %v444_v57  ;;  %v1141_v46 = vpop.permute.xlu1 %1140 }
  0xb3   :  { %v800_v10 = vmul.f32 %v2333_v33, %v445_v45  ;;  %v920_v63 = vmul.f32 %v2337_v6, %v445_v45  ;;  %v795_v58 = vadd.f32 %v793_v47, %v788_v62  ;;  %v796_v39 = vadd.f32 %v793_v47, %v789_v34 }
  0xb4   :  { %v805_v27 = vmul.f32 %v2338_v13, %v610_v3  ;;  %v806_v0 = vmul.f32 %v2339_v36, %v611_v31  ;;  %v915_v21 = vadd.f32 %v913_v2, %v909_v5  ;;  %v916_v59 = vadd.f32 %v913_v2, %v910_v44 }
  0xb5   :  { %v2340_v11 = vstv %s1909_s14  ;;  %v801_v22 = vadd.f32 %v799_v56, %v795_v58  ;;  %v802_v55 = vadd.f32 %v800_v10, %v796_v39  ;;  %v2342_v7 = vstv %s1917_s15 }
  0xb6   :  { %v811_v32 = vmul.f32 %v2340_v11, %v776_v50  ;;  %v2341_v28 = vmov %v2340_v11  ;;  %v925_v47 = vmul.f32 %v2342_v7, %v610_v3  ;;  %v2343_v4 = vmov %v2342_v7 }
  0xb7   :  { %v812_v26 = vmul.f32 %v2341_v28, %v777_v35  ;;  %v926_v15 = vmul.f32 %v2343_v4, %v611_v31  ;;  %v921_v42 = vadd.f32 %v919_v51, %v915_v21  ;;  %v922_v30 = vadd.f32 %v920_v63, %v916_v59 }
  0xb8   :  { %v2344_v19 = vstv %s1925_s16  ;;  %v807_v2 = vadd.f32 %v805_v27, %v801_v22  ;;  %v808_v62 = vadd.f32 %v806_v0, %v802_v55  ;;  %v2346_v34 = vstv %s1927_s17  ;;  %v1027_v0 = vpop.permute.xlu0 %1026 }
  0xb9   :  { %v931_v14 = vmul.f32 %v2344_v19, %v776_v50  ;;  %v2345_v38 = vmov %v2344_v19  ;;  %v1137_v53 = vmul.f32 %v2346_v34, %v278_v17  ;;  %v2347_v56 = vmov %v2346_v34 }
  0xba   :  { %v932_v16 = vmul.f32 %v2345_v38, %v777_v35  ;;  %v1138_v33 = vmul.f32 %v2347_v56, %v279_v24  ;;  %v2348_v10 = vstv %s1949_s18  ;;  %v2350_v44 = vstv %s1963_s19 }
  0xbb   :  { %v1147_v37 = vmul.f32 %v2348_v10, %v444_v57  ;;  %v2349_v5 = vmov %v2348_v10  ;;  %v1153_v25 = vmul.f32 %v2350_v44, %v610_v3  ;;  %v2351_v51 = vmov %v2350_v44 }
  0xbc   :  { %v1148_v23 = vmul.f32 %v2349_v5, %v445_v45  ;;  %v1154_v6 = vmul.f32 %v2351_v51, %v611_v31  ;;  %v1143_v63 = vadd.f32 %v1141_v46, %v1137_v53  ;;  %v1144_v58 = vadd.f32 %v1141_v46, %v1138_v33 }
  0xbd   :  { %v2352_v39 = vstv %s1968_s20  ;;  %v2354_v21 = vstv %s1980_s21  ;;  %v2356_v22 = vstv %s1994_s22  ;;  %v1039_v34 = vmul.f32 %v1038_v40, %v610_v3 }
  0xbe   :  { %v1159_v13 = vmul.f32 %v2352_v39, %v776_v50  ;;  %v2353_v27 = vmov %v2352_v39  ;;  %v1023_v59 = vmul.f32 %v2354_v21, %v278_v17  ;;  %v2355_v11 = vmov %v2354_v21 }
  0xbf   :  { %v1160_v36 = vmul.f32 %v2353_v27, %v777_v35  ;;  %v1024_v28 = vmul.f32 %v2355_v11, %v279_v24  ;;  %v1033_v55 = vmul.f32 %v2356_v22, %v444_v57  ;;  %v2357_v7 = vmov %v2356_v22 }
  0xc0   :  { %v1034_v4 = vmul.f32 %v2357_v7, %v445_v45  ;;  %v1149_v19 = vadd.f32 %v1147_v37, %v1143_v63  ;;  %v1150_v38 = vadd.f32 %v1148_v23, %v1144_v58  ;;  %v1040_v53 = vmul.f32 %v1038_v40, %v611_v31 }
  0xc1   :  { %v1045_v46 = vmul.f32 %v1044_v48, %v776_v50  ;;  %v1046_v56 = vmul.f32 %v1044_v48, %v777_v35  ;;  %v1029_v33 = vadd.f32 %v1027_v0, %v1023_v59  ;;  %v1030_v10 = vadd.f32 %v1027_v0, %v1024_v28 }
  0xc2   :  { %v1155_v5 = vadd.f32 %v1153_v25, %v1149_v19  ;;  %v1156_v17 = vadd.f32 %v1154_v6, %v1150_v38  ;;  %v813_v44 = vadd.f32 %v811_v32, %v807_v2  ;;  %v814_v24 = vadd.f32 %v812_v26, %v808_v62 }
  0xc3   :  { %v1035_v51 = vadd.f32 %v1033_v55, %v1029_v33  ;;  %v1036_v57 = vadd.f32 %v1034_v4, %v1030_v10  ;;  %v927_v39 = vadd.f32 %v925_v47, %v921_v42  ;;  %v928_v45 = vadd.f32 %v926_v15, %v922_v30 }
  0xc4   :  { %v1161_v37 = vadd.f32 %v1159_v13, %v1155_v5  ;;  %v1162_v23 = vadd.f32 %v1160_v36, %v1156_v17  ;;  %v903_v3 = vsub.f32 %v813_v44, %v2213_v1  ;;  %v904_v40 = vsub.f32 %v814_v24, %v2216_v18 }
  0xc5   :  { %v1041_v31 = vadd.f32 %v1039_v34, %v1035_v51  ;;  %v1042_v50 = vadd.f32 %v1040_v53, %v1036_v57  ;;  %v933_v63 = vadd.f32 %v931_v14, %v927_v39  ;;  %v934_v48 = vadd.f32 %v932_v16, %v928_v45 }
  0xc6   :  { %v1119_v35 = vsel %vm170_vm6, %v1108_v43, %v2207_v61  ;;  %v1126_v32 = vsel %vm170_vm6, %v1112_v60, %v2210_v52  ;;  %v905_v26 = vmul.f32 %v903_v3, %v903_v3  ;;  %v906_v1 = vmul.f32 %v904_v40, %v904_v40 }
  0xc7   :  { %v1047_v47 = vadd.f32 %v1045_v46, %v1041_v31  ;;  %v1048_v18 = vadd.f32 %v1046_v56, %v1042_v50  ;;  %v1015_v15 = vsub.f32 %v933_v63, %v2219_v41  ;;  %v1016_v42 = vsub.f32 %v934_v48, %v2222_v20 }
  0xc8   :  { %v1243_v30 = vsub.f32 %v1161_v37, %v2192_v9  ;;  %v1244_v49 = vsub.f32 %v1162_v23, %v2198_v12  ;;  %v1422_v36 = vmov 1966171168   ;;  %v2358_v53 = vlaneseq }
  0xc9   :  { %v1129_v14 = vsub.f32 %v1047_v47, %v1119_v35  ;;  %v1130_v43 = vsub.f32 %v1048_v18, %v1126_v32  ;;  %v1017_v61 = vmul.f32 %v1015_v15, %v1015_v15  ;;  %v1018_v16 = vmul.f32 %v1016_v42, %v1016_v42 }
  0xca   :  { %v1245_v52 = vmul.f32 %v1243_v30, %v1243_v30  ;;  %v1246_v62 = vmul.f32 %v1244_v49, %v1244_v49  ;;  %v1265_v12 = vunpack.c.l.s4 %v1422_v36  ;;  %vm1281_vm7 = vcmp.lt.s32.totalorder %v2358_v53, 256 }
  0xcb   :  { %v1131_v2 = vmul.f32 %v1129_v14, %v1129_v14  ;;  %v1132_v54 = vmul.f32 %v1130_v43, %v1130_v43  ;;  %v1019_v29 = vadd.f32 %v1017_v61, %v905_v26  ;;  %v1020_v60 = vadd.f32 %v1018_v16, %v906_v1 }
  0xcc   :  { %v1266_v28 = vunpack.c.0.s8 %v1265_v12 }
  0xcd   :  { %v1133_v25 = vadd.f32 %v1131_v2, %v1019_v29  ;;  %v1134_v6 = vadd.f32 %v1132_v54, %v1020_v60 }
  0xce   :  { %v1269_v19 = vsub.s32 %v1266_v28, %v1470_v8 }
  0xcf   :  { %v1247_v58 = vadd.f32 %v1245_v52, %v1133_v25  ;;  %v1248_v41 = vadd.f32 %v1246_v62, %v1134_v6 }
  0xd1   :  { %v1249_v13 = vrot.slane %v1247_v58, 4  ;;  %v1255_v20 = vrot.slane %v1248_v41, 4 }
  0xd3   :  { %v1250_v27 = vadd.f32 %v1249_v13, %v1247_v58  ;;  %v1256_v9 = vadd.f32 %v1255_v20, %v1248_v41 }
  0xd5   :  { %v1251_v0 = vrot.slane %v1250_v27, 2  ;;  %v1257_v21 = vrot.slane %v1256_v9, 2 }
  0xd7   :  { %v1252_v59 = vadd.f32 %v1251_v0, %v1250_v27  ;;  %v1258_v11 = vadd.f32 %v1257_v21, %v1256_v9 }
  0xd9   :  { %v1253_v22 = vrot.slane %v1252_v59, 1  ;;  %v1259_v55 = vrot.slane %v1258_v11, 1 }
  0xdb   :  { %v1254_v7 = vadd.f32 %v1253_v22, %v1252_v59  ;;  %v1260_v4 = vadd.f32 %v1259_v55, %v1258_v11 }
  0xdd   :  { %v1263_v38 = vcombine.low %v1254_v7, %v1260_v4 }
  0xdf   :  { %v1270_v34 = vrot.slane %v1263_v38, %v1269_v19 }
  0xe1   :  { %v1277_v46 = vrot.slane %v1270_v34, %v1269_v19 }
  0xe3   :  { %1283 = vst.msk [vmem:[#allocation9] sm:$0x3] %vm1281_vm7, %v1277_v46 }
  0xe4   :  { %1396 = shalt.err (!%p1393_p5)
}
  0xe5   :  { %1293 = dma.vmem_to_hbm [thread:$0]  %s1291_s26, 32, %s2330_s5, [#allocation4]  }
  0xe6   :  { %1411 = dma.done.wait [#allocation4], 32  }
  0xe7   :  { %1412 = vsyncadd [#allocation4], 4294967264 }
  0xe8   :  { %1297 = vsyncpa [#allocation3], 1 }
  0xe9   :  { %1298 = vsyncpa [#allocation7], 1 }
  0xea   :  { %1299 = vsyncpa [#allocation4], 1 }
  0xeb   :  { %1300 = vsyncpa [#allocation5], 1 }

</bundles_post_ra>
